<compile_context>
chip_gen: v7x
topology: tpu7x:2x2x1
jax: 0.10.0
libtpu: 0.0.40
codegen_flags: <defaults>
</compile_context>

<pallas_src>
import jax
import jax.numpy as jnp
from jax.experimental import pallas as pl
from jax.experimental.pallas import tpu as pltpu


def mae_loss_kernel(out_ref, lab_ref, loss_ref):
    # out_ref: (TM, C) input dtype, lab_ref: (TM, 1) i32, loss_ref: (1, TM) f32
    x = out_ref[...].astype(jnp.float32)                        # (TM, C)
    # numerically-stable softmax numerator along classes (dim=1)
    m = jnp.max(x, axis=1, keepdims=True)                       # (TM, 1)
    e = jnp.exp(x - m)                                          # (TM, C)
    s = jnp.sum(e, axis=1)                                      # (TM,)
    # "gather" the label column of e via masked reduction (no dynamic gather on TPU)
    labs = lab_ref[...]                                         # (TM, 1) int32
    col = jax.lax.broadcasted_iota(jnp.int32, x.shape, 1)       # (TM, C)
    e_lab = jnp.sum(jnp.where(col == labs, e, 0.0), axis=1)     # (TM,)
    # softmax prob of the label; approx reciprocal runs on the EUP slot (nearly free)
    f_j = e_lab * pl.reciprocal(s, approx=True)                 # (TM,)
    loss_row = 2.0 - 2.0 * f_j                                  # (TM,)
    loss_ref[...] = jnp.reshape(loss_row, (1, loss_row.shape[0]))


def _choose_block_rows(n_rows, n_cols, itemsize, vmem_block_bytes):
    """Largest row tile that keeps one input block under vmem_block_bytes."""
    tm = max(8, vmem_block_bytes // (n_cols * itemsize))
    if tm >= 128:
        tm = (tm // 128) * 128        # lane-dense output stores
    else:
        tm = max(8, (tm // 8) * 8)
    n_pad8 = ((n_rows + 7) // 8) * 8  # don't tile beyond the (8-padded) problem
    return min(tm, n_pad8)


def mae_loss(outputs: jax.Array, labels: jax.Array, *, block_rows: int | None = None,
             vmem_block_bytes: int = 2 * 1024 * 1024) -> jax.Array:
    """outputs: (N, C) float, labels: (N,) int — returns (N, 1) float32."""
    N, C = outputs.shape
    itemsize = jnp.dtype(outputs.dtype).itemsize
    tm = block_rows if block_rows is not None else _choose_block_rows(
        N, C, itemsize, vmem_block_bytes)

    num_tiles = pl.cdiv(N, tm)
    n_pad = num_tiles * tm

    labels2d = labels.astype(jnp.int32).reshape(N, 1)
    if n_pad != N:
        # pad rows; padded rows compute garbage that is sliced off below
        outputs = jnp.pad(outputs, ((0, n_pad - N), (0, 0)))
        labels2d = jnp.pad(labels2d, ((0, n_pad - N), (0, 0)))

    out2d = pl.pallas_call(
        mae_loss_kernel,
        out_shape=jax.ShapeDtypeStruct((num_tiles, tm), jnp.float32),
        grid_spec=pltpu.PrefetchScalarGridSpec(
            num_scalar_prefetch=0,
            grid=(num_tiles,),
            in_specs=[
                pl.BlockSpec((tm, C), lambda i: (i, 0)),
                pl.BlockSpec((tm, 1), lambda i: (i, 0)),
            ],
            out_specs=pl.BlockSpec((1, tm), lambda i: (i, 0)),
        ),
        compiler_params=pltpu.CompilerParams(
            dimension_semantics=("parallel",),
            vmem_limit_bytes=32 * 1024 * 1024,
        ),
    )(outputs, labels2d)

    return out2d.reshape(-1)[:N].reshape(N, 1)


def mae_loss_ref(outputs, labels):
    p = jax.nn.softmax(outputs.astype(jnp.float32), axis=1)
    f_j = jnp.take_along_axis(p, labels[:, None].astype(jnp.int32), axis=1)
    return 2.0 - 2.0 * f_j


if __name__ == "__main__":
    key = jax.random.PRNGKey(0)
    k1, k2, k3, k4 = jax.random.split(key, 4)

    # Case 1: small, tile == batch
    N, C = 16, 32
    outputs = jax.random.normal(k1, (N, C), dtype=jnp.float32)
    labels = jax.random.randint(k2, (N,), 0, C, dtype=jnp.int32)
    loss = mae_loss(outputs, labels)
    jax.block_until_ready(loss)
    ref = mae_loss_ref(outputs, labels)
    assert loss.shape == (N, 1)
    assert jnp.allclose(loss, ref, atol=2e-3, rtol=2e-3)

    # Case 2: batch not a multiple of the tile (exercises padding path)
    N2, C2 = 37, 40
    outputs2 = jax.random.normal(k3, (N2, C2), dtype=jnp.float32)
    labels2 = jax.random.randint(k4, (N2,), 0, C2, dtype=jnp.int32)
    loss2 = mae_loss(outputs2, labels2)
    jax.block_until_ready(loss2)
    ref2 = mae_loss_ref(outputs2, labels2)
    assert loss2.shape == (N2, 1)
    assert jnp.allclose(loss2, ref2, atol=2e-3, rtol=2e-3)

    print("KERNEL_OK")
</pallas_src>

<mosaic_0001>
module attributes {stable_mosaic.version = 11 : i64} {
  func.func @mae_loss_kernel(%arg0: i32, %arg1: memref<16x32xf32, #tpu.memory_space<vmem>>, %arg2: memref<16x1xi32, #tpu.memory_space<vmem>>, %arg3: memref<1x16xf32, #tpu.memory_space<vmem>>) attributes {dimension_semantics = [#tpu.dimension_semantics<parallel>], iteration_bounds = array<i64: 1>, scalar_prefetch = 0 : i64, scratch_operands = 0 : i64, tpu.core_type = #tpu.core_type<tc>, window_params = [{transform_indices = @transform_0, window_bounds = array<i64: 16, 32>}, {transform_indices = @transform_1, window_bounds = array<i64: 16, 1>}, {transform_indices = @transform_2, window_bounds = array<i64: 1, 16>}]} {
    %c0 = arith.constant 0 : index
    %c0_0 = arith.constant 0 : index
    %0 = vector.load %arg1[%c0, %c0_0] : memref<16x32xf32, #tpu.memory_space<vmem>>, vector<16x32xf32>
    %cst = arith.constant dense<0xFF800000> : vector<16xf32>
    %1 = vector.multi_reduction <maximumf>, %0, %cst [1] : vector<16x32xf32> to vector<16xf32>
    %2 = vector.shape_cast %1 : vector<16xf32> to vector<16x1xf32>
    %3 = vector.broadcast %2 : vector<16x1xf32> to vector<16x32xf32>
    %4 = arith.subf %0, %3 : vector<16x32xf32>
    %5 = math.exp %4 : vector<16x32xf32>
    %cst_1 = arith.constant dense<0.000000e+00> : vector<16xf32>
    %6 = vector.multi_reduction <add>, %5, %cst_1 [1] : vector<16x32xf32> to vector<16xf32>
    %c0_2 = arith.constant 0 : index
    %c0_3 = arith.constant 0 : index
    %7 = vector.load %arg2[%c0_2, %c0_3] : memref<16x1xi32, #tpu.memory_space<vmem>>, vector<16x1xi32>
    %8 = tpu.iota {dimensions = array<i32: 1>} : vector<16x32xi32>
    %9 = vector.broadcast %7 : vector<16x1xi32> to vector<16x32xi32>
    %10 = arith.cmpi eq, %8, %9 : vector<16x32xi32>
    %cst_4 = arith.constant 0.000000e+00 : f32
    %11 = vector.broadcast %cst_4 : f32 to vector<16x32xf32>
    %12 = arith.select %10, %5, %11 : vector<16x32xi1>, vector<16x32xf32>
    %cst_5 = arith.constant dense<0.000000e+00> : vector<16xf32>
    %13 = vector.multi_reduction <add>, %12, %cst_5 [1] : vector<16x32xf32> to vector<16xf32>
    %14 = tpu.reciprocal %6 {approx = true} : vector<16xf32> -> vector<16xf32>
    %15 = arith.mulf %13, %14 : vector<16xf32>
    %cst_6 = arith.constant 2.000000e+00 : f32
    %16 = vector.broadcast %cst_6 : f32 to vector<16xf32>
    %17 = arith.mulf %16, %15 : vector<16xf32>
    %cst_7 = arith.constant 2.000000e+00 : f32
    %18 = vector.broadcast %cst_7 : f32 to vector<16xf32>
    %19 = arith.subf %18, %17 : vector<16xf32>
    %20 = vector.shape_cast %19 : vector<16xf32> to vector<1x16xf32>
    %c0_8 = arith.constant 0 : index
    %c0_9 = arith.constant 0 : index
    %21 = vector.load %arg3[%c0_8, %c0_9] : memref<1x16xf32, #tpu.memory_space<vmem>>, vector<1x16xf32>
    tpu.vector_store %arg3[%c0_8, %c0_9], %20 {strides = array<i32>} : memref<1x16xf32, #tpu.memory_space<vmem>>, vector<1x16xf32>,
    return
  }
  func.func @transform_0(%arg0: i32) -> (i32, i32) {
    %c0_i32 = arith.constant 0 : i32
    %c0_i32_0 = arith.constant 0 : i32
    return %arg0, %c0_i32 : i32, i32
  }
  func.func @transform_1(%arg0: i32) -> (i32, i32) {
    %c0_i32 = arith.constant 0 : i32
    %c0_i32_0 = arith.constant 0 : i32
    return %arg0, %c0_i32 : i32, i32
  }
  func.func @transform_2(%arg0: i32) -> (i32, i32) {
    %c0_i32 = arith.constant 0 : i32
    %c0_i32_0 = arith.constant 0 : i32
    return %arg0, %c0_i32 : i32, i32
  }
}

</mosaic_0001>

<bundles_post_ra>
// kernel: tpu_custom_call.1
= control target key start
LH: loop header
LB: loop body
LE: loop exit
PB: predicated region body
PF: predicated region fallthrough
CT: control target
= control target key end

     0   :  { %vm14_vm0 = vcmask 261120   ;;  %v127_v4 = vmov 0   ;;  %s174_s0 = inlined_call_operand.vmem [shape: f32[16,32], index: 0, kind: input, shape index: {}]   ;;  %s175_s1 = inlined_call_operand.vmem [shape: s32[16,1], index: 1, kind: input, shape index: {}]   ;;  %s176_s2 = inlined_call_operand.hbm [shape: f32[1,16], index: 2, kind: output, shape index: {}]  }
   0x1   :  { %v12_v0 = vld [vmem:[%s174_s0] sm:$0xff]  ;;  %v13_v1 = vld [vmem:[%s174_s0 + $0x8] sm:$0xff]  ;;  %93 = vset.pattern.permute.xlu1 %v127_v4  ;;  %94 = vset.pattern.permute.xlu0 %v127_v4 }
   0x2   :  { %v33_v2 = vld [vmem:[%s175_s1] sm:$0xff]  ;;  %v15_v3 = vsel %vm14_vm0, %v12_v0, -inf }
   0x3   :  { %7 = vsyncpa [#allocation3], 0  ;;  %16 = vmax.xlane.f32.xlu0 %v15_v3  ;;  %38 = vperm.xlu1 %93, %v33_v2   ;;  %v18_v5 = vsel %vm14_vm0, %v13_v1, -inf  ;;  %v34_v6 = vld [vmem:[%s175_s1 + $0x8] sm:$0xff]  ;;  %v35_v12 = vlaneseq  ;;  %s128_s0 = smov [#allocation2]   ;;  %vm72_vm3 = vcmask 130112  }
   0x4   :  { %s83_s1 = sshll.u32 %s128_s0, 4  ;;  %vm75_vm4 = vcmask 122880   ;;  %s84_s1 = int_to_ptr.vmem [resolvable:$true] %s83_s1 }
   0x5   :  { %v36_v15 = vand.u32 127, %v35_v12  ;;  %v64_v30 = vshrl.u32 %v35_v12, 7  ;;  %s103_s17 = scalar_lea.vmem %s84_s1, 16  ;;  %s107_s18 = scalar_lea.vmem %s84_s1, 32 }
   0x6   :  { %p104_p0 = scmp.ne.s32.totalorder %s84_s1, %s103_s17  ;;  %p108_p1 = scmp.lt.s32.totalorder %s84_s1, %s84_s1 }
   0x7   :  { %19 = vmax.xlane.f32.xlu0 %v18_v5  ;;  %41 = vperm.xlu1 %93, %v34_v6   ;;  %v67_v32 = vadd.s32 4294967288, %v36_v15  ;;  %v65_v36 = vsub.s32 %v36_v15, %v64_v30  ;;  %p109_p2 = scmp.lt.s32.totalorder %s107_s18, %s103_s17 }
   0x9   :  { %v70_v38 = vsub.s32 %v67_v32, %v64_v30  ;;  %p110_p3 = por %p109_p2, %p108_p1 }
   0xb   :  { %p111_p4 = pnand %p110_p3, %p104_p0 }
  0x82   :  { %v39_v14 = vpop.permute.xlu1 %38 }
  0x83   :  { %vm43_vm1 = vcmp.eq.s32.totalorder %v36_v15, %v39_v14 }
  0x86   :  { %v42_v17 = vpop.permute.xlu1 %41 }
  0x87   :  { %vm44_vm2 = vcmp.eq.s32.totalorder %v36_v15, %v42_v17 }
  0x90   :  { %v17_v7 = vpop.xlane.xlu0 %16 }
  0x91   :  { %v21_v8 = vsub.f32 %v12_v0, %v17_v7 }
  0x93   :  { %v23_v9 = vmul.f32 1.442695, %v21_v8 }
  0x94   :  { %v20_v10 = vpop.xlane.xlu0 %19 }
  0x95   :  { %95 = vpow2.f32 %v23_v9  ;;  %v22_v11 = vsub.f32 %v13_v1, %v20_v10 }
  0x97   :  { %v25_v13 = vmul.f32 1.442695, %v22_v11 }
  0x99   :  { %97 = vpow2.f32 %v25_v13 }
  0x9f   :  { %v96_v16 = vpop.eup %95 }
  0xa0   :  { %v27_v18 = vsel %vm14_vm0, %v96_v16, 0.0  ;;  %v45_v19 = vsel %vm43_vm1, %v96_v16, 0.0 }
  0xa1   :  { %28 = vadd.xlane.f32.xlu0 %v27_v18  ;;  %v47_v21 = vsel %vm14_vm0, %v45_v19, 0.0 }
  0xa3   :  { %v98_v20 = vpop.eup %97 }
  0xa4   :  { %v30_v22 = vsel %vm14_vm0, %v98_v20, 0.0  ;;  %v46_v23 = vsel %vm44_vm2, %v98_v20, 0.0 }
  0xa5   :  { %48 = vadd.xlane.f32.xlu0 %v47_v21  ;;  %31 = vadd.xlane.f32.xlu1 %v30_v22  ;;  %v50_v24 = vsel %vm14_vm0, %v46_v23, 0.0 }
  0xa9   :  { %51 = vadd.xlane.f32.xlu0 %v50_v24 }
 0x12e   :  { %v29_v25 = vpop.xlane.xlu0 %28 }
 0x12f   :  { %99 = vrcp.f32 %v29_v25 }
 0x132   :  { %v32_v26 = vpop.xlane.xlu1 %31  ;;  %v49_v27 = vpop.xlane.xlu0 %48 }
 0x133   :  { %101 = vrcp.f32 %v32_v26 }
 0x136   :  { %v52_v34 = vpop.xlane.xlu0 %51 }
 0x139   :  { %v100_v28 = vpop.eup %99 }
 0x13a   :  { %v55_v29 = vmul.f32 %v100_v28, %v49_v27 }
 0x13c   :  { %v57_v31 = vmul.f32 2.0, %v55_v29 }
 0x13d   :  { %v102_v33 = vpop.eup %101 }
 0x13e   :  { %v56_v35 = vmul.f32 %v102_v33, %v52_v34  ;;  %v59_v37 = vsub.f32 2.0, %v57_v31 }
 0x140   :  { %v58_v39 = vmul.f32 2.0, %v56_v35  ;;  %v66_v41 = vrot.slane %v59_v37, %v65_v36 }
 0x142   :  { %v60_v40 = vsub.f32 2.0, %v58_v39 }
 0x144   :  { %v71_v42 = vrot.slane %v60_v40, %v70_v38 }
 0x146   :  { %v73_v43 = vsel %vm72_vm3, %v71_v42, %v66_v41 }
 0x147   :  { %76 = vst.msk [vmem:[#allocation2] sm:$0x1] %vm75_vm4, %v73_v43 }
 0x148   :  { %114 = shalt.err (!%p111_p4)
}
 0x149   :  { %s115_s21 = scalar_lea.hbm %s176_s2, 16 }
 0x14a   :  { %p116_p5 = scmp.ne.s32.totalorder %s176_s2, %s115_s21  ;;  %p119_p6 = scmp.lt.u32.totalorder %s115_s21, %s176_s2 }
 0x14c   :  { %p121_p7 = pnand %p119_p6, %p116_p5 }
 0x14e   :  { %124 = shalt.err (!%p121_p7)
}
 0x14f   :  { %86 = dma.vmem_to_hbm [thread:$0]  %s84_s1, 16, %s176_s2, [#allocation3]  }
 0x150   :  { %125 = dma.done.wait [#allocation3], 16  }
 0x151   :  { %126 = vsyncadd [#allocation3], 4294967280 }
 0x152   :  { %90 = vsyncpa [#allocation3], 1 }

</bundles_post_ra>
